<compile_context>
chip_gen: v7x
topology: tpu7x:2x2x1
jax: 0.10.0
libtpu: 0.0.40
codegen_flags: <defaults>
</compile_context>

<pallas_src>
import functools

import jax
import jax.numpy as jnp
from jax.experimental import pallas as pl
from jax.experimental.pallas import tpu as pltpu


def dropout_classifier_kernel(x_ref, w1_ref, b1_ref, w2_ref, b2_ref,
                              w3_ref, b3_ref, out_ref):
    # In-kernel bf16 cast of the x tile (cheap VPU work hidden under the tile DMA).
    x = x_ref[...].astype(jnp.bfloat16)

    # --- linear1 + clamp(min=0): bf16 MXU operands, f32 accumulate ---
    h = jnp.dot(x, w1_ref[...], preferred_element_type=jnp.float32)
    h = jnp.maximum(h + b1_ref[...], 0.0)

    # --- middle layer (num_layers - 2 == 1) + clamp(min=0) ---
    h = jnp.dot(h.astype(jnp.bfloat16), w2_ref[...],
                preferred_element_type=jnp.float32)
    h = jnp.maximum(h + b2_ref[...], 0.0)

    # --- linear3: exact num_labels output columns (no lane padding) ---
    logits = jnp.dot(h.astype(jnp.bfloat16), w3_ref[...],
                     preferred_element_type=jnp.float32) + b3_ref[...]

    # --- log_softmax over dim=1 (label axis); max/sum on XLU, exp/log on EUP ---
    m = jnp.max(logits, axis=-1, keepdims=True)
    shifted = logits - m
    lse = jnp.log(jnp.sum(jnp.exp(shifted), axis=-1, keepdims=True))
    out_ref[...] = (shifted - lse).astype(out_ref.dtype)


def _pick_batch_tile(batch, input_size, out_width, *,
                     vmem_budget_bytes=8 << 20, min_grid_steps=4, max_tile=4096):
    """Batch tile from a VMEM budget, capped so the grid has >= min_grid_steps steps."""
    # Rough per-row VMEM cost of the pipeline: double-buffered f32 x and out tiles,
    # the in-kernel bf16 copy of x, and generous headroom for f32/bf16 intermediates.
    per_row = 2 * input_size * 4 + input_size * 2 + 2 * out_width * 4 + 1024
    tb_budget = max(8, (vmem_budget_bytes // per_row) // 8 * 8)
    tb_budget = min(tb_budget, max_tile)
    # Keep at least min_grid_steps grid steps when the batch allows it (v7x dual-TC
    # sharding + pipeline depth); round UP to a multiple of 8 so padding stays minimal.
    tb_steps = -(-batch // min_grid_steps)          # ceil(batch / min_grid_steps)
    tb_steps = max(8, -(-tb_steps // 8) * 8)        # round up to multiple of 8
    return min(tb_budget, tb_steps)


@jax.jit
def dropout_classifier_forward(x, w1, b1, w2, b2, w3, b3):
    batch, input_size = x.shape
    num_labels = w3.shape[1]

    # Weights are expected bf16-at-rest (no-op casts if already bf16); biases f32.
    w1 = w1.astype(jnp.bfloat16)
    w2 = w2.astype(jnp.bfloat16)
    w3 = w3.astype(jnp.bfloat16)
    b1 = b1.astype(jnp.float32)
    b2 = b2.astype(jnp.float32)
    b3 = b3.astype(jnp.float32)

    tb = _pick_batch_tile(batch, input_size, num_labels)
    padded_batch = -(-batch // tb) * tb
    if padded_batch != batch:
        # Pad the batch so every grid step gets a full tile (garbage rows are cheap).
        x = jnp.pad(x, ((0, padded_batch - batch), (0, 0)))
    grid = (padded_batch // tb,)

    x_spec = pl.BlockSpec((tb, input_size), lambda i: (i, 0))
    out_spec = pl.BlockSpec((tb, num_labels), lambda i: (i, 0))
    const = lambda shape: pl.BlockSpec(shape, lambda i: (0, 0))  # VMEM-resident block

    out = pl.pallas_call(
        dropout_classifier_kernel,
        out_shape=jax.ShapeDtypeStruct((padded_batch, num_labels), jnp.float32),
        grid=grid,
        in_specs=[
            x_spec,
            const(w1.shape), const(b1.shape),
            const(w2.shape), const(b2.shape),
            const(w3.shape), const(b3.shape),
        ],
        out_specs=out_spec,
        compiler_params=pltpu.CompilerParams(
            dimension_semantics=("parallel",),   # batch tiles shard across v7x's 2 TCs
            vmem_limit_bytes=32 << 20,           # covers v5e's 16 MiB scoped default
        ),
    )(x, w1, b1, w2, b2, w3, b3)

    if padded_batch != batch:
        out = out[:batch]
    return out


def init_linear(key, in_features, out_features):
    """Deterministic init mimicking nn.Linear's uniform(-1/sqrt(in), 1/sqrt(in)).
    Returns W in (in_features, out_features) layout and b as (1, out_features)."""
    k_w, k_b = jax.random.split(key)
    bound = 1.0 / jnp.sqrt(jnp.float32(in_features))
    w = jax.random.uniform(k_w, (in_features, out_features), jnp.float32, -bound, bound)
    b = jax.random.uniform(k_b, (1, out_features), jnp.float32, -bound, bound)
    return w, b


if __name__ == "__main__":
    # Small shapes consistent with the module's constructor.
    vocab = [f"tok{i}" for i in range(16)]   # len(vocab) = 16
    num_labels = 8
    hidden_size = 32
    num_layers = 3                           # => exactly one middle layer
    input_size = num_labels * len(vocab)     # 128
    batch = 10                               # non-multiple of 8: exercises the pad/slice path

    root = jax.random.PRNGKey(0)
    k_x, k1, k2, k3 = jax.random.split(root, 4)

    x = jax.random.normal(k_x, (batch, input_size), jnp.float32)
    w1, b1 = init_linear(k1, input_size, hidden_size)
    w2, b2 = init_linear(k2, hidden_size, hidden_size)   # middle layer
    w3, b3 = init_linear(k3, hidden_size, num_labels)

    # Store the weights bf16-at-rest (MXU operand dtype); biases stay f32.
    w1b, w2b, w3b = (w.astype(jnp.bfloat16) for w in (w1, w2, w3))

    out = dropout_classifier_forward(x, w1b, b1, w2b, b2, w3b, b3)
    out = jax.block_until_ready(out)

    # Reference in plain JAX with the same bf16-operand / f32-accumulate matmul recipe.
    def bf16_dot(a, b):
        return jnp.dot(a.astype(jnp.bfloat16), b.astype(jnp.bfloat16),
                       preferred_element_type=jnp.float32)

    h_ref = jnp.maximum(bf16_dot(x, w1) + b1, 0.0)
    h_ref = jnp.maximum(bf16_dot(h_ref, w2) + b2, 0.0)
    logits_ref = bf16_dot(h_ref, w3) + b3
    ref = jax.nn.log_softmax(logits_ref, axis=1)

    assert out.shape == (batch, num_labels)
    assert jnp.allclose(out, ref, atol=1e-2, rtol=1e-2), "mismatch vs JAX reference"
    # Rows must sum to 1 in probability space.
    assert jnp.allclose(jnp.sum(jnp.exp(out), axis=1), 1.0, atol=1e-3)

    print("KERNEL_OK")
</pallas_src>

<mosaic_0001>
module attributes {stable_mosaic.version = 11 : i64} {
  func.func @dropout_classifier_kernel(%arg0: i32, %arg1: memref<8x128xf32, #tpu.memory_space<vmem>>, %arg2: memref<128x32xbf16, #tpu.memory_space<vmem>>, %arg3: memref<1x32xf32, #tpu.memory_space<vmem>>, %arg4: memref<32x32xbf16, #tpu.memory_space<vmem>>, %arg5: memref<1x32xf32, #tpu.memory_space<vmem>>, %arg6: memref<32x8xbf16, #tpu.memory_space<vmem>>, %arg7: memref<1x8xf32, #tpu.memory_space<vmem>>, %arg8: memref<8x8xf32, #tpu.memory_space<vmem>>) attributes {dimension_semantics = [#tpu.dimension_semantics<parallel>], iteration_bounds = array<i64: 2>, scalar_prefetch = 0 : i64, scratch_operands = 0 : i64, tpu.core_type = #tpu.core_type<tc>, window_params = [{transform_indices = @transform_0, window_bounds = array<i64: 8, 128>}, {pipeline_mode = #tpu.pipeline_mode<synchronous>, transform_indices = @transform_1, window_bounds = array<i64: 128, 32>}, {pipeline_mode = #tpu.pipeline_mode<synchronous>, transform_indices = @transform_2, window_bounds = array<i64: 1, 32>}, {pipeline_mode = #tpu.pipeline_mode<synchronous>, transform_indices = @transform_3, window_bounds = array<i64: 32, 32>}, {pipeline_mode = #tpu.pipeline_mode<synchronous>, transform_indices = @transform_4, window_bounds = array<i64: 1, 32>}, {pipeline_mode = #tpu.pipeline_mode<synchronous>, transform_indices = @transform_5, window_bounds = array<i64: 32, 8>}, {pipeline_mode = #tpu.pipeline_mode<synchronous>, transform_indices = @transform_6, window_bounds = array<i64: 1, 8>}, {transform_indices = @transform_7, window_bounds = array<i64: 8, 8>}]} {
    %c0 = arith.constant 0 : index
    %c0_0 = arith.constant 0 : index
    %0 = vector.load %arg1[%c0, %c0_0] : memref<8x128xf32, #tpu.memory_space<vmem>>, vector<8x128xf32>
    %1 = arith.truncf %0 : vector<8x128xf32> to vector<8x128xbf16>
    %c0_1 = arith.constant 0 : index
    %c0_2 = arith.constant 0 : index
    %2 = vector.load %arg2[%c0_1, %c0_2] : memref<128x32xbf16, #tpu.memory_space<vmem>>, vector<128x32xbf16>
    %cst = arith.constant dense<0.000000e+00> : vector<8x32xf32>
    %3 = tpu.matmul %1, %2, %cst {dimension_numbers = #tpu.dot_dimension_numbers<[1], [0], [0], [1], [0, 0, 1, 1], [], []>} : vector<8x128xbf16>, vector<128x32xbf16>, vector<8x32xf32> -> vector<8x32xf32>
    %c0_3 = arith.constant 0 : index
    %c0_4 = arith.constant 0 : index
    %4 = vector.load %arg3[%c0_3, %c0_4] : memref<1x32xf32, #tpu.memory_space<vmem>>, vector<1x32xf32>
    %5 = vector.broadcast %4 : vector<1x32xf32> to vector<8x32xf32>
    %6 = arith.addf %3, %5 : vector<8x32xf32>
    %cst_5 = arith.constant 0.000000e+00 : f32
    %7 = vector.broadcast %cst_5 : f32 to vector<8x32xf32>
    %8 = arith.maximumf %6, %7 : vector<8x32xf32>
    %9 = arith.truncf %8 : vector<8x32xf32> to vector<8x32xbf16>
    %c0_6 = arith.constant 0 : index
    %c0_7 = arith.constant 0 : index
    %10 = vector.load %arg4[%c0_6, %c0_7] : memref<32x32xbf16, #tpu.memory_space<vmem>>, vector<32x32xbf16>
    %cst_8 = arith.constant dense<0.000000e+00> : vector<8x32xf32>
    %11 = tpu.matmul %9, %10, %cst_8 {dimension_numbers = #tpu.dot_dimension_numbers<[1], [0], [0], [1], [0, 0, 1, 1], [], []>} : vector<8x32xbf16>, vector<32x32xbf16>, vector<8x32xf32> -> vector<8x32xf32>
    %c0_9 = arith.constant 0 : index
    %c0_10 = arith.constant 0 : index
    %12 = vector.load %arg5[%c0_9, %c0_10] : memref<1x32xf32, #tpu.memory_space<vmem>>, vector<1x32xf32>
    %13 = vector.broadcast %12 : vector<1x32xf32> to vector<8x32xf32>
    %14 = arith.addf %11, %13 : vector<8x32xf32>
    %cst_11 = arith.constant 0.000000e+00 : f32
    %15 = vector.broadcast %cst_11 : f32 to vector<8x32xf32>
    %16 = arith.maximumf %14, %15 : vector<8x32xf32>
    %17 = arith.truncf %16 : vector<8x32xf32> to vector<8x32xbf16>
    %c0_12 = arith.constant 0 : index
    %c0_13 = arith.constant 0 : index
    %18 = vector.load %arg6[%c0_12, %c0_13] : memref<32x8xbf16, #tpu.memory_space<vmem>>, vector<32x8xbf16>
    %cst_14 = arith.constant dense<0.000000e+00> : vector<8x8xf32>
    %19 = tpu.matmul %17, %18, %cst_14 {dimension_numbers = #tpu.dot_dimension_numbers<[1], [0], [0], [1], [0, 0, 1, 1], [], []>} : vector<8x32xbf16>, vector<32x8xbf16>, vector<8x8xf32> -> vector<8x8xf32>
    %c0_15 = arith.constant 0 : index
    %c0_16 = arith.constant 0 : index
    %20 = vector.load %arg7[%c0_15, %c0_16] : memref<1x8xf32, #tpu.memory_space<vmem>>, vector<1x8xf32>
    %21 = vector.broadcast %20 : vector<1x8xf32> to vector<8x8xf32>
    %22 = arith.addf %19, %21 : vector<8x8xf32>
    %cst_17 = arith.constant dense<0xFF800000> : vector<8xf32>
    %23 = vector.multi_reduction <maximumf>, %22, %cst_17 [1] : vector<8x8xf32> to vector<8xf32>
    %24 = vector.shape_cast %23 : vector<8xf32> to vector<8x1xf32>
    %25 = vector.broadcast %24 : vector<8x1xf32> to vector<8x8xf32>
    %26 = arith.subf %22, %25 : vector<8x8xf32>
    %27 = math.exp %26 : vector<8x8xf32>
    %cst_18 = arith.constant dense<0.000000e+00> : vector<8xf32>
    %28 = vector.multi_reduction <add>, %27, %cst_18 [1] : vector<8x8xf32> to vector<8xf32>
    %29 = vector.shape_cast %28 : vector<8xf32> to vector<8x1xf32>
    %30 = math.log %29 : vector<8x1xf32>
    %31 = vector.broadcast %30 : vector<8x1xf32> to vector<8x8xf32>
    %32 = arith.subf %26, %31 : vector<8x8xf32>
    %c0_19 = arith.constant 0 : index
    %c0_20 = arith.constant 0 : index
    %33 = vector.load %arg8[%c0_19, %c0_20] : memref<8x8xf32, #tpu.memory_space<vmem>>, vector<8x8xf32>
    tpu.vector_store %arg8[%c0_19, %c0_20], %32 {strides = array<i32>} : memref<8x8xf32, #tpu.memory_space<vmem>>, vector<8x8xf32>,
    return
  }
  func.func @transform_0(%arg0: i32) -> (i32, i32) {
    %c0_i32 = arith.constant 0 : i32
    %c0_i32_0 = arith.constant 0 : i32
    return %arg0, %c0_i32 : i32, i32
  }
  func.func @transform_1(%arg0: i32) -> (i32, i32) {
    %c0_i32 = arith.constant 0 : i32
    %c0_i32_0 = arith.constant 0 : i32
    %c0_i32_1 = arith.constant 0 : i32
    return %c0_i32, %c0_i32_0 : i32, i32
  }
  func.func @transform_2(%arg0: i32) -> (i32, i32) {
    %c0_i32 = arith.constant 0 : i32
    %c0_i32_0 = arith.constant 0 : i32
    %c0_i32_1 = arith.constant 0 : i32
    return %c0_i32, %c0_i32_0 : i32, i32
  }
  func.func @transform_3(%arg0: i32) -> (i32, i32) {
    %c0_i32 = arith.constant 0 : i32
    %c0_i32_0 = arith.constant 0 : i32
    %c0_i32_1 = arith.constant 0 : i32
    return %c0_i32, %c0_i32_0 : i32, i32
  }
  func.func @transform_4(%arg0: i32) -> (i32, i32) {
    %c0_i32 = arith.constant 0 : i32
    %c0_i32_0 = arith.constant 0 : i32
    %c0_i32_1 = arith.constant 0 : i32
    return %c0_i32, %c0_i32_0 : i32, i32
  }
  func.func @transform_5(%arg0: i32) -> (i32, i32) {
    %c0_i32 = arith.constant 0 : i32
    %c0_i32_0 = arith.constant 0 : i32
    %c0_i32_1 = arith.constant 0 : i32
    return %c0_i32, %c0_i32_0 : i32, i32
  }
  func.func @transform_6(%arg0: i32) -> (i32, i32) {
    %c0_i32 = arith.constant 0 : i32
    %c0_i32_0 = arith.constant 0 : i32
    %c0_i32_1 = arith.constant 0 : i32
    return %c0_i32, %c0_i32_0 : i32, i32
  }
  func.func @transform_7(%arg0: i32) -> (i32, i32) {
    %c0_i32 = arith.constant 0 : i32
    %c0_i32_0 = arith.constant 0 : i32
    return %arg0, %c0_i32 : i32, i32
  }
}

</mosaic_0001>

<bundles_post_ra>
// kernel: dropout_classifier_forward.1
= control target key start
LH: loop header
LB: loop body
LE: loop exit
PB: predicated region body
PF: predicated region fallthrough
CT: control target
= control target key end

     0   :  { %s745_s24 = smov 0   ;;  %s822_s0 = inlined_call_operand.vmem [shape: f32[16,128], index: 0, kind: input, shape index: {}]   ;;  %s823_s1 = inlined_call_operand.vmem [shape: bf16[128,32], index: 1, kind: input, shape index: {}]   ;;  %s824_s2 = inlined_call_operand.vmem [shape: f32[1,32], index: 2, kind: input, shape index: {}]   ;;  %s825_s3 = inlined_call_operand.vmem [shape: bf16[32,32], index: 3, kind: input, shape index: {}]   ;;  %s826_s4 = inlined_call_operand.vmem [shape: f32[1,32], index: 4, kind: input, shape index: {}]   ;;  %s827_s5 = inlined_call_operand.vmem [shape: bf16[32,8], index: 5, kind: input, shape index: {}]   ;;  %s828_s6 = inlined_call_operand.vmem [shape: f32[1,8], index: 6, kind: input, shape index: {}]   ;;  %s829_s7 = inlined_call_operand.vmem [shape: f32[16,8], index: 7, kind: output, shape index: {}]  }
   0x1 LB: > { %s592_s25 = sadd.s32 4294967295, %s701_s24   ;;  %p596_p0 = scmp.ge.s32.totalorder %s701_s24, 1  ;;  %s701_s24 = sphi %s745_s24, %s17_s24  }
   0x2   : > { %p236_p1 = scmp.lt.s32.totalorder %s701_s24, 3 }
   0x4   : > { %p237_p2 = pnand %p596_p0, %p236_p1 }
   0x5   : > { %v679_v0 = vld [vmem:[%s823_s1] sm:$0xff] (!%p237_p2)   ;;  %v703_v1 = vmov (!%p237_p2), 0.0   ;;  %v680_v2 = vld [vmem:[%s823_s1 + $0x8] sm:$0xff] (!%p237_p2)   ;;  %vm704_vm0 = vmmov (!%p237_p2), 0   ;;  %v681_v3 = vld [vmem:[%s823_s1 + $0x10] sm:$0xff] (!%p237_p2)   ;;  %p266_p3 = scmp.lt.s32.totalorder (!%p237_p2), %s592_s25, 1 }
   0x6   : > { %240 = sbr.rel (%p237_p2) target bundleno = 1005 (0x3ed), region = 48  ;;  %633 = vmatprep.subr.bf16.mxu0 (!%p237_p2), %v703_v1  ;;  %653 = vmatprep.subr.bf16.mxu1 (!%p237_p2), %v703_v1  ;;  %v682_v4 = vld [vmem:[%s823_s1 + $0x18] sm:$0xff] (!%p237_p2)   ;;  %v683_v5 = vld [vmem:[%s823_s1 + $0x20] sm:$0xff] (!%p237_p2)   ;;  %v684_v6 = vld [vmem:[%s823_s1 + $0x28] sm:$0xff] (!%p237_p2)   ;;  %vm413_vm1 = vcmask (!%p237_p2), 261120   ;;  %vm525_vm2 = vcmask (!%p237_p2), 64512  }
   0x7   : > { %634 = vmatpush3.bf16.msra.mxu0 (!%p237_p2), %v679_v0  ;;  %649 = vmatprep.mubr.msk.bf16.mxu0 (!%p237_p2), %vm704_vm0, %v703_v1  ;;  %v685_v7 = vld [vmem:[%s823_s1 + $0x30] sm:$0xff] (!%p237_p2)   ;;  %v686_v8 = vld [vmem:[%s823_s1 + $0x38] sm:$0xff] (!%p237_p2)   ;;  %v687_v11 = vld [vmem:[%s825_s3] sm:$0xff] (!%p237_p2)  }
   0x8   : > { %635 = vmatprep.subr.bf16.mxu0 (!%p237_p2), %v703_v1  ;;  %657 = vmatprep.mubr.msk.bf16.mxu1 (!%p237_p2), %vm704_vm0, %v703_v1  ;;  %v688_v12 = vld [vmem:[%s825_s3 + $0x8] sm:$0xff] (!%p237_p2)   ;;  %v599_v13 = vld [vmem:[%s824_s2] ss:$0 sm:$0xff] (!%p237_p2) }
   0x9   : > { %654 = vmatpush3.bf16.msra.mxu1 (!%p237_p2), %v687_v11  ;;  %v689_v20 = vld [vmem:[%s827_s5] sm:$0xff] (!%p237_p2)   ;;  %v690_v22 = vld [vmem:[%s827_s5 + $0x8] sm:$0xff] (!%p237_p2)  }
   0xa   : > { %655 = vmatprep.subr.bf16.mxu1 (!%p237_p2), %v703_v1  ;;  %v608_v23 = vld [vmem:[%s826_s4] ss:$0 sm:$0xff] (!%p237_p2) }
   0xb   : > { %636 = vmatpush3.bf16.msra.mxu0 (!%p237_p2), %v680_v2  ;;  %v612_v31 = vld [vmem:[%s828_s6] ss:$0 sm:$0xff] (!%p237_p2) }
   0xc   : > { %637 = vmatprep.subr.bf16.mxu0 (!%p237_p2), %v703_v1 }
   0xd   : > { %s831_s25 = smov (!%p266_p3, %s592_s25), 1  ;;  %656 = vmatpush3.bf16.msra.mxu1 %v688_v12 }
   0xe   : > { %s597_s15 = sshll.u32 %s831_s25, 3  ;;  %661 = vmatprep.subr.bf16.mxu1 %v703_v1 }
   0xf   : > { %638 = vmatpush3.bf16.msra.mxu0 %v681_v3  ;;  %s269_s20 = scalar_lea.vmem %s822_s0, %s597_s15  ;;  %s273_s19 = scalar_lea.vmem %s829_s7, %s597_s15 }
  0x10   : > { %639 = vmatprep.subr.bf16.mxu0 %v703_v1  ;;  %v275_v9 = vld [vmem:[%s269_s20] sm:$0xff] }
  0x11   : > { %v276_v10 = vpack.c.bf16 %v275_v9, %v275_v9 }
  0x13   : > { %640 = vmatpush3.bf16.msra.mxu0 %v682_v4 }
  0x14   : > { %641 = vmatprep.subr.bf16.mxu0 %v703_v1 }
  0x17   : > { %642 = vmatpush3.bf16.msra.mxu0 %v683_v5 }
  0x18   : > { %643 = vmatprep.subr.bf16.mxu0 %v703_v1 }
  0x1b   : > { %644 = vmatpush3.bf16.msra.mxu0 %v684_v6 }
  0x1c   : > { %645 = vmatprep.subr.bf16.mxu0 %v703_v1 }
  0x1f   : > { %646 = vmatpush3.bf16.msra.mxu0 %v685_v7 }
  0x20   : > { %647 = vmatprep.subr.bf16.mxu0 %v703_v1 }
  0x23   : > { %648 = vmatpush3.bf16.msra.mxu0 %v686_v8 }
  0x26   : > { %650 = vmatmul.mubr.bf16.vlgmr.msra.gmra.mrb[0].mxu0 %v276_v10 }
  0xf9   : > { %v382_v14 = vpop.f32.mrb[0].mxu0 }
  0xfa   : > { %v383_v15 = vadd.f32 %v599_v13, %v382_v14  ;;  %v651_v16 = vpop.f32.mrb[1].mxu0 }
  0xfb   : > { %v385_v17 = vpop.f32.mrb[2].mxu0 }
  0xfc   : > { %v388_v18 = vmax.f32 %v383_v15, 0.0  ;;  %v652_v19 = vpop.f32.mrb[3].mxu0 }
  0xfe   : > { %v389_v21 = vpack.c.bf16 %v388_v18, %v388_v18 }
 0x100   : > { %658 = vmatmul.mubr.msk.bf16.vlgmr.msra.gmra.mrb[0].mxu1 %vm413_vm1, %v389_v21 }
 0x101   : > { %662 = vmatpush3.bf16.msra.mxu1 %v689_v20  ;;  %665 = vmatprep.mubr.msk.bf16.mxu1 %vm704_vm0, %v703_v1 }
 0x102   : > { %663 = vmatprep.subr.bf16.mxu1 %v703_v1 }
 0x105   : > { %664 = vmatpush3.bf16.msra.mxu1 %v690_v22 }
 0x1d3   : > { %v451_v24 = vpop.f32.mrb[0].mxu1 }
 0x1d4   : > { %v452_v25 = vadd.f32 %v608_v23, %v451_v24  ;;  %v659_v26 = vpop.f32.mrb[1].mxu1 }
 0x1d5   : > { %v454_v27 = vpop.f32.mrb[2].mxu1 }
 0x1d6   : > { %v457_v28 = vmax.f32 %v452_v25, 0.0  ;;  %v660_v29 = vpop.f32.mrb[3].mxu1 }
 0x1d8   : > { %v458_v30 = vpack.c.bf16 %v457_v28, %v457_v28 }
 0x1da   : > { %666 = vmatmul.mubr.msk.bf16.vlgmr.msra.gmra.mrb[4].mxu1 %vm413_vm1, %v458_v30 }
 0x2ad   : > { %v519_v32 = vpop.f32.mrb[4].mxu1 }
 0x2ae   : > { %v520_v33 = vadd.f32 %v612_v31, %v519_v32  ;;  %v667_v34 = vpop.f32.mrb[5].mxu1 }
 0x2af   : > { %v522_v35 = vpop.f32.mrb[6].mxu1 }
 0x2b0   : > { %v668_v36 = vpop.f32.mrb[7].mxu1  ;;  %v526_v37 = vsel %vm525_vm2, %v520_v33, -inf }
 0x2b1   : > { %527 = vmax.xlane.f32.xlu0 %v526_v37 }
 0x33e   : > { %v528_v38 = vpop.xlane.xlu0 %527 }
 0x33f   : > { %v529_v39 = vsub.f32 %v520_v33, %v528_v38 }
 0x341   : > { %v530_v40 = vmul.f32 1.442695, %v529_v39 }
 0x343   : > { %691 = vpow2.f32 %v530_v40 }
 0x34d   : > { %v692_v41 = vpop.eup %691 }
 0x34e   : > { %v532_v42 = vsel %vm525_vm2, %v692_v41, 0.0 }
 0x34f   : > { %533 = vadd.xlane.f32.xlu0 %v532_v42 }
 0x3dc   : > { %v534_v43 = vpop.xlane.xlu0 %533 }
 0x3dd   : > { %693 = vlog2.f32 %v534_v43 }
 0x3e7   : > { %v694_v44 = vpop.eup %693 }
 0x3e8   : > { %v536_v45 = vmul.f32 0.6931472, %v694_v44 }
 0x3ea   : > { %v537_v46 = vsub.f32 %v529_v39, %v536_v45 }
 0x3ec   : > { %538 = vst.msk [vmem:[%s273_s19] sm:$0xff] %vm525_vm2, %v537_v46 }
 0x3ed PF: > { %s17_s24 = sadd.s32 1, %s701_s24  }
 0x3ee   : > { %p14_p4 = scmp.ge.s32.totalorder %s17_s24, 4  }
 0x3f0   :  { %16 = sbr.rel (!%p14_p4) target bundleno = 1 (0x1), region = 78 }

</bundles_post_ra>
